<compile_context>
chip_gen: v5e
topology: v5e:2x2
jax: 0.10.0
libtpu: 0.0.40
codegen_flags: <defaults>
</compile_context>

<pallas_src>
import functools

import jax
import jax.numpy as jnp
from jax import lax
from jax.experimental import pallas as pl
from jax.experimental.pallas import tpu as pltpu


_VMEM_LIMIT_BYTES = 48 * 1024 * 1024  # < 64 MiB so it is valid on v7x as well as v5e/v6e.

_SQRT_2_OVER_PI = 0.7978845608028654


def _gelu(x):
    return 0.5 * x * (1.0 + jnp.tanh(_SQRT_2_OVER_PI * (x + 0.044715 * x * x * x)))


def _pick_tile(dim, target, align):
    """Largest tile <= target that is a multiple of `align` and divides `dim`.

    Falls back to the full dim (always legal w.r.t. the (8,128) block rule)."""
    if dim <= target:
        return dim
    t = (target // align) * align
    while t >= align:
        if dim % t == 0:
            return t
        t -= align
    return dim


# ----------------------------------------------------------------------------
# Kernel 1: tiled GEMM  y = x @ W + b  (used for the fused QKV projection)
# ----------------------------------------------------------------------------
def _matmul_kernel(x_ref, w_ref, b_ref, o_ref, acc_ref, *, compute_dtype):
    @pl.when(pl.program_id(2) == 0)
    def _():
        acc_ref[...] = jnp.zeros_like(acc_ref)

    acc_ref[...] += jnp.dot(
        x_ref[...].astype(compute_dtype), w_ref[...],
        preferred_element_type=jnp.float32)

    @pl.when(pl.program_id(2) == pl.num_programs(2) - 1)
    def _():
        o_ref[...] = (acc_ref[...] + b_ref[...]).astype(o_ref.dtype)


def fused_linear(x, w, b, *, compute_dtype=jnp.float32,
                 tm_target=256, tn_target=256, tk_target=512):
    """x: [M, K] fp32, w: [K, N], b: [N] -> [M, N] fp32 (tiled + pipelined)."""
    M, K = x.shape
    _, N = w.shape
    tm = _pick_tile(M, tm_target, 8)
    tn = _pick_tile(N, tn_target, 128)
    tk = _pick_tile(K, tk_target, 128)
    kernel = functools.partial(_matmul_kernel, compute_dtype=compute_dtype)
    return pl.pallas_call(
        kernel,
        out_shape=jax.ShapeDtypeStruct((M, N), jnp.float32),
        grid=(M // tm, N // tn, K // tk),
        in_specs=[
            pl.BlockSpec((tm, tk), lambda i, j, k: (i, k)),
            pl.BlockSpec((tk, tn), lambda i, j, k: (k, j)),
            pl.BlockSpec((1, tn), lambda i, j, k: (0, j)),
        ],
        out_specs=pl.BlockSpec((tm, tn), lambda i, j, k: (i, j)),
        scratch_shapes=[pltpu.VMEM((tm, tn), jnp.float32)],
        compiler_params=pltpu.CompilerParams(
            dimension_semantics=("parallel", "parallel", "arbitrary"),
            vmem_limit_bytes=_VMEM_LIMIT_BYTES),
    )(x, w.astype(compute_dtype), b.reshape(1, N).astype(jnp.float32))


# ----------------------------------------------------------------------------
# Kernel 2: attention + W_o projection + residual add + LayerNorm1, per batch
#   qkv_ref: [1, S, 3*H*D], res_ref: [1, S, hidden]
#   -> o_ref: [1, S, hidden], p_ref: [1, H, S, S]
# The merged-head [S, H*D] attention result never leaves VMEM.
# ----------------------------------------------------------------------------
def _attn_oproj_ln_kernel(qkv_ref, res_ref, wo_ref, bo_ref, g_ref, beta_ref,
                          o_ref, p_ref, *, num_heads, head_dim, eps, compute_dtype):
    qkv = qkv_ref[0]                                   # [S, 3*H*D], fp32
    HD = num_heads * head_dim
    scale = 1.0 / (head_dim ** 0.5)

    outs, probs = [], []
    # Static Python loop over heads (H is small).  For large S this kernel would be
    # tiled over the query axis with online softmax (flash style).
    # TODO(synk): query/KV tiling (flash attention) for large sequence lengths.
    for h in range(num_heads):
        lo = h * head_dim
        q = (qkv[:, lo:lo + head_dim] * scale).astype(compute_dtype)            # [S, D]
        k = qkv[:, HD + lo:HD + lo + head_dim].astype(compute_dtype)            # [S, D]
        v = qkv[:, 2 * HD + lo:2 * HD + lo + head_dim].astype(compute_dtype)    # [S, D]

        # Q @ K^T via dot_general contracting D of both operands (no XLU transpose).
        s = lax.dot_general(q, k, (((1,), (1,)), ((), ())),
                            preferred_element_type=jnp.float32)                 # [S, S]

        # NOTE: masked_fill in the reference is a no-op (result discarded) -> no masking.
        m = jnp.max(s, axis=-1, keepdims=True)
        e = jnp.exp(s - m)
        l = jnp.sum(e, axis=-1, keepdims=True)
        p = e * pl.reciprocal(l, approx=True)                                   # softmax
        probs.append(p)

        outs.append(jnp.dot(p.astype(compute_dtype), v,
                            preferred_element_type=jnp.float32))                # [S, D]

    attn = jnp.concatenate(outs, axis=-1)                                        # [S, H*D]

    # Fused epilogue: W_o projection + residual + LayerNorm1 (all in VMEM).
    y = jnp.dot(attn.astype(compute_dtype), wo_ref[...],
                preferred_element_type=jnp.float32)
    y = y + bo_ref[...] + res_ref[0]
    mean = jnp.mean(y, axis=-1, keepdims=True)
    c = y - mean
    var = jnp.mean(c * c, axis=-1, keepdims=True)
    o_ref[0] = (c * lax.rsqrt(var + eps) * g_ref[...] + beta_ref[...]).astype(o_ref.dtype)
    p_ref[0] = jnp.stack(probs, axis=0).astype(p_ref.dtype)                      # [H, S, S]


def attention_oproj_layernorm(qkv, residual, w_o, b_o, gamma, beta, *,
                              num_heads, head_dim, eps, compute_dtype):
    """qkv: [B, S, 3*H*D], residual: [B, S, hidden]
       -> (out [B, S, hidden], probs [B, H, S, S])."""
    B, S, threeHD = qkv.shape
    hidden = residual.shape[-1]
    HD = num_heads * head_dim
    kernel = functools.partial(_attn_oproj_ln_kernel, num_heads=num_heads,
                               head_dim=head_dim, eps=eps, compute_dtype=compute_dtype)
    return pl.pallas_call(
        kernel,
        out_shape=(
            jax.ShapeDtypeStruct((B, S, hidden), jnp.float32),
            jax.ShapeDtypeStruct((B, num_heads, S, S), jnp.float32),
        ),
        grid=(B,),
        in_specs=[
            pl.BlockSpec((1, S, threeHD), lambda b: (b, 0, 0)),
            pl.BlockSpec((1, S, hidden), lambda b: (b, 0, 0)),
            pl.BlockSpec((HD, hidden), lambda b: (0, 0)),
            pl.BlockSpec((1, hidden), lambda b: (0, 0)),
            pl.BlockSpec((1, hidden), lambda b: (0, 0)),
            pl.BlockSpec((1, hidden), lambda b: (0, 0)),
        ],
        out_specs=(
            pl.BlockSpec((1, S, hidden), lambda b: (b, 0, 0)),
            pl.BlockSpec((1, num_heads, S, S), lambda b: (b, 0, 0, 0)),
        ),
        compiler_params=pltpu.CompilerParams(
            dimension_semantics=("parallel",),
            vmem_limit_bytes=_VMEM_LIMIT_BYTES),
    )(qkv, residual, w_o.astype(compute_dtype), b_o.reshape(1, hidden),
      gamma.reshape(1, hidden), beta.reshape(1, hidden))


# ----------------------------------------------------------------------------
# Kernel 3: FeedForward (linear1 + GELU + linear2) + residual + LayerNorm2
#   residual == the FFN input (output of LayerNorm1), so it is read once.
# ----------------------------------------------------------------------------
def _ffn_add_ln_kernel(x_ref, w1_ref, b1_ref, w2_ref, b2_ref, g_ref, beta_ref, o_ref,
                       *, eps, compute_dtype):
    x = x_ref[...]                                                   # fp32 [tm, hidden]
    h = jnp.dot(x.astype(compute_dtype), w1_ref[...],
                preferred_element_type=jnp.float32) + b1_ref[...]
    h = _gelu(h)                                                     # [tm, ffn] stays in VMEM
    y = jnp.dot(h.astype(compute_dtype), w2_ref[...],
                preferred_element_type=jnp.float32) + b2_ref[...]
    # TODO(synk): dropout is identity (inference mode).
    y = y + x                                                        # residual add
    mean = jnp.mean(y, axis=-1, keepdims=True)
    c = y - mean
    var = jnp.mean(c * c, axis=-1, keepdims=True)
    o_ref[...] = (c * lax.rsqrt(var + eps) * g_ref[...] + beta_ref[...]).astype(o_ref.dtype)


def ffn_add_layernorm(x, w1, b1, w2, b2, gamma, beta, eps, compute_dtype):
    """x: [M, hidden] -> LayerNorm(linear2(gelu(linear1(x))) + x)."""
    M, H = x.shape
    F = w1.shape[1]
    tm = _pick_tile(M, 256, 8)
    # TODO(synk): for large feed_forward_dim, tile the ffn axis instead of keeping
    #             both weight matrices fully resident in VMEM.
    kernel = functools.partial(_ffn_add_ln_kernel, eps=eps, compute_dtype=compute_dtype)
    return pl.pallas_call(
        kernel,
        out_shape=jax.ShapeDtypeStruct((M, H), jnp.float32),
        grid=(M // tm,),
        in_specs=[
            pl.BlockSpec((tm, H), lambda i: (i, 0)),
            pl.BlockSpec((H, F), lambda i: (0, 0)),
            pl.BlockSpec((1, F), lambda i: (0, 0)),
            pl.BlockSpec((F, H), lambda i: (0, 0)),
            pl.BlockSpec((1, H), lambda i: (0, 0)),
            pl.BlockSpec((1, H), lambda i: (0, 0)),
            pl.BlockSpec((1, H), lambda i: (0, 0)),
        ],
        out_specs=pl.BlockSpec((tm, H), lambda i: (i, 0)),
        compiler_params=pltpu.CompilerParams(
            dimension_semantics=("parallel",),
            vmem_limit_bytes=_VMEM_LIMIT_BYTES),
    )(x, w1.astype(compute_dtype), b1.reshape(1, F), w2.astype(compute_dtype),
      b2.reshape(1, H), gamma.reshape(1, H), beta.reshape(1, H))


# ----------------------------------------------------------------------------
# Module wrapper (parameters + glue; all heavy math runs in the Pallas kernels)
# ----------------------------------------------------------------------------
class EncoderLayerPallas:
    def __init__(self, hidden_dim, num_heads, head_dim, feed_forward_dim,
                 dropout_prob, layer_norm_eps, key, compute_dtype=jnp.float32):
        assert num_heads * head_dim == hidden_dim, "merge-heads requires H*D == hidden_dim"
        self.hidden_dim = hidden_dim
        self.num_heads = num_heads
        self.head_dim = head_dim
        self.feed_forward_dim = feed_forward_dim
        self.dropout_prob = dropout_prob          # inference mode: identity
        self.eps = layer_norm_eps
        # bf16 recommended on v6e/v7x MXUs (fp32 accumulation); fp32 matches PyTorch numerics.
        self.compute_dtype = compute_dtype

        proj = num_heads * head_dim
        ks = jax.random.split(key, 12)

        def u(k_, shape, fan_in):
            bound = 1.0 / (fan_in ** 0.5)
            return jax.random.uniform(k_, shape, jnp.float32, -bound, bound)

        # weights stored [in, out] (== torch Linear weight.T)
        w_q, b_q = u(ks[0], (hidden_dim, proj), hidden_dim), u(ks[1], (proj,), hidden_dim)
        w_k, b_k = u(ks[2], (hidden_dim, proj), hidden_dim), u(ks[3], (proj,), hidden_dim)
        w_v, b_v = u(ks[4], (hidden_dim, proj), hidden_dim), u(ks[5], (proj,), hidden_dim)
        # Fused QKV weight: one GEMM reads the activations once (3x less HBM traffic).
        self.w_qkv = jnp.concatenate([w_q, w_k, w_v], axis=1)       # [hidden, 3*proj]
        self.b_qkv = jnp.concatenate([b_q, b_k, b_v], axis=0)       # [3*proj]

        self.w_o, self.b_o = u(ks[6], (proj, hidden_dim), proj), u(ks[7], (hidden_dim,), proj)

        self.w1, self.b1 = (u(ks[8], (hidden_dim, feed_forward_dim), hidden_dim),
                            u(ks[9], (feed_forward_dim,), hidden_dim))
        self.w2, self.b2 = (u(ks[10], (feed_forward_dim, hidden_dim), feed_forward_dim),
                            u(ks[11], (hidden_dim,), feed_forward_dim))

        self.ln1_g = jnp.ones((hidden_dim,), jnp.float32)
        self.ln1_b = jnp.zeros((hidden_dim,), jnp.float32)
        self.ln2_g = jnp.ones((hidden_dim,), jnp.float32)
        self.ln2_b = jnp.zeros((hidden_dim,), jnp.float32)

    def __call__(self, inputs, attention_mask):
        # attention_mask intentionally unused: the reference's masked_fill is out-of-place
        # and its result is discarded, so masking has no effect on the output.
        del attention_mask
        B, S, Hd = inputs.shape
        H, D = self.num_heads, self.head_dim
        HD = H * D
        cd = self.compute_dtype

        x = inputs.reshape(B * S, Hd)                                # fp32 residual source

        # 1) fused QKV projection (tiled, pipelined GEMM)
        qkv = fused_linear(x, self.w_qkv, self.b_qkv, compute_dtype=cd)   # [B*S, 3*H*D]
        qkv = qkv.reshape(B, S, 3 * HD)                              # free reshape, no transpose

        # 2) attention + W_o + residual + LayerNorm1 (single fused kernel per batch element)
        out1, attn_prob = attention_oproj_layernorm(
            qkv, inputs, self.w_o, self.b_o, self.ln1_g, self.ln1_b,
            num_heads=H, head_dim=D, eps=self.eps, compute_dtype=cd)  # [B,S,hid], [B,H,S,S]

        # 3) FFN + residual + LayerNorm2 (fused)
        out2 = ffn_add_layernorm(out1.reshape(B * S, Hd), self.w1, self.b1,
                                 self.w2, self.b2, self.ln2_g, self.ln2_b,
                                 self.eps, cd)

        return out2.reshape(B, S, self.hidden_dim), attn_prob


# ----------------------------------------------------------------------------
# Pure-JAX reference (same params, fp32) for correctness checking
# ----------------------------------------------------------------------------
def _layernorm_ref(x, g, b, eps):
    mean = jnp.mean(x, axis=-1, keepdims=True)
    var = jnp.mean((x - mean) ** 2, axis=-1, keepdims=True)
    return (x - mean) * lax.rsqrt(var + eps) * g + b


def reference_forward(layer, inputs):
    B, S, Hd = inputs.shape
    H, D = layer.num_heads, layer.head_dim
    x = inputs.reshape(B * S, Hd)
    qkv = (x @ layer.w_qkv + layer.b_qkv).reshape(B, S, 3, H, D)
    q = jnp.transpose(qkv[:, :, 0], (0, 2, 1, 3))                    # [B,H,S,D]
    k = jnp.transpose(qkv[:, :, 1], (0, 2, 1, 3))
    v = jnp.transpose(qkv[:, :, 2], (0, 2, 1, 3))
    s = jnp.einsum("bhid,bhjd->bhij", q, k) / (D ** 0.5)
    p = jax.nn.softmax(s, axis=-1)                                   # mask is a no-op
    o = jnp.einsum("bhij,bhjd->bhid", p, v)
    o = jnp.transpose(o, (0, 2, 1, 3)).reshape(B * S, H * D)
    y = _layernorm_ref(o @ layer.w_o + layer.b_o + x, layer.ln1_g, layer.ln1_b, layer.eps)
    h = _gelu(y @ layer.w1 + layer.b1)
    z = _layernorm_ref(h @ layer.w2 + layer.b2 + y, layer.ln2_g, layer.ln2_b, layer.eps)
    return z.reshape(B, S, Hd), p


# ----------------------------------------------------------------------------
if __name__ == "__main__":
    hidden_dim, num_heads, head_dim = 32, 4, 8      # num_heads*head_dim == hidden_dim
    feed_forward_dim = 64
    batch, seq = 2, 8
    dropout_prob = 0.1
    layer_norm_eps = 1e-5

    root = jax.random.PRNGKey(0)
    k_param, k_x = jax.random.split(root)

    layer = EncoderLayerPallas(hidden_dim, num_heads, head_dim, feed_forward_dim,
                               dropout_prob, layer_norm_eps, k_param,
                               compute_dtype=jnp.float32)

    inputs = jax.random.normal(k_x, (batch, seq, hidden_dim), jnp.float32)
    attention_mask = jnp.zeros((batch, seq, seq), dtype=jnp.bool_)

    outputs, attn_prob = layer(inputs, attention_mask)
    jax.block_until_ready((outputs, attn_prob))

    assert outputs.shape == (batch, seq, hidden_dim)
    assert attn_prob.shape == (batch, num_heads, seq, seq)

    ref_out, ref_prob = reference_forward(layer, inputs)
    assert bool(jnp.allclose(attn_prob, ref_prob, atol=5e-3, rtol=5e-3))
    assert bool(jnp.allclose(outputs, ref_out, atol=5e-3, rtol=5e-3))
    assert bool(jnp.allclose(jnp.sum(attn_prob, axis=-1), 1.0, atol=5e-3))

    # Exercise the bf16-MXU path recommended for v6e / v7x (fp32 accumulation).
    layer.compute_dtype = jnp.bfloat16
    out_bf16, prob_bf16 = layer(inputs, attention_mask)
    jax.block_until_ready((out_bf16, prob_bf16))
    assert bool(jnp.all(jnp.isfinite(out_bf16)))
    assert bool(jnp.allclose(jnp.sum(prob_bf16, axis=-1), 1.0, atol=3e-2))

    print("KERNEL_OK")
</pallas_src>

<mosaic_0001>
module attributes {stable_mosaic.version = 11 : i64} {
  func.func @_matmul_kernel(%arg0: i32, %arg1: i32, %arg2: i32, %arg3: memref<16x32xf32, #tpu.memory_space<vmem>>, %arg4: memref<32x96xf32, #tpu.memory_space<vmem>>, %arg5: memref<1x96xf32, #tpu.memory_space<vmem>>, %arg6: memref<16x96xf32, #tpu.memory_space<vmem>>, %arg7: memref<16x96xf32, #tpu.memory_space<vmem>>) attributes {dimension_semantics = [#tpu.dimension_semantics<parallel>, #tpu.dimension_semantics<parallel>, #tpu.dimension_semantics<arbitrary>], iteration_bounds = array<i64: 1, 1, 1>, scalar_prefetch = 0 : i64, scratch_operands = 1 : i64, tpu.core_type = #tpu.core_type<tc>, window_params = [{transform_indices = @transform_0, window_bounds = array<i64: 16, 32>}, {transform_indices = @transform_1, window_bounds = array<i64: 32, 96>}, {transform_indices = @transform_2, window_bounds = array<i64: 1, 96>}, {transform_indices = @transform_3, window_bounds = array<i64: 16, 96>}]} {
    %c0_i32 = arith.constant 0 : i32
    %0 = arith.cmpi eq, %arg2, %c0_i32 : i32
    %1 = arith.extui %0 : i1 to i32
    %c0_i32_0 = arith.constant 0 : i32
    %2 = arith.cmpi ne, %1, %c0_i32_0 : i32
    scf.if %2 {
      %cst_10 = arith.constant 0.000000e+00 : f32
      %12 = vector.broadcast %cst_10 : f32 to vector<16x96xf32>
      %c0_11 = arith.constant 0 : index
      %c0_12 = arith.constant 0 : index
      %13 = vector.load %arg7[%c0_11, %c0_12] : memref<16x96xf32, #tpu.memory_space<vmem>>, vector<16x96xf32>
      tpu.vector_store %arg7[%c0_11, %c0_12], %12 {strides = array<i32>} : memref<16x96xf32, #tpu.memory_space<vmem>>, vector<16x96xf32>,
    } else {
    }
    %c0 = arith.constant 0 : index
    %c0_1 = arith.constant 0 : index
    %3 = vector.load %arg7[%c0, %c0_1] : memref<16x96xf32, #tpu.memory_space<vmem>>, vector<16x96xf32>
    %c0_2 = arith.constant 0 : index
    %c0_3 = arith.constant 0 : index
    %4 = vector.load %arg3[%c0_2, %c0_3] : memref<16x32xf32, #tpu.memory_space<vmem>>, vector<16x32xf32>
    %c0_4 = arith.constant 0 : index
    %c0_5 = arith.constant 0 : index
    %5 = vector.load %arg4[%c0_4, %c0_5] : memref<32x96xf32, #tpu.memory_space<vmem>>, vector<32x96xf32>
    %cst = arith.constant dense<0.000000e+00> : vector<16x96xf32>
    %6 = tpu.matmul %4, %5, %cst {dimension_numbers = #tpu.dot_dimension_numbers<[1], [0], [0], [1], [0, 0, 1, 1], [], []>} : vector<16x32xf32>, vector<32x96xf32>, vector<16x96xf32> -> vector<16x96xf32>
    %7 = arith.addf %3, %6 : vector<16x96xf32>
    %c0_6 = arith.constant 0 : index
    %c0_7 = arith.constant 0 : index
    %8 = vector.load %arg7[%c0_6, %c0_7] : memref<16x96xf32, #tpu.memory_space<vmem>>, vector<16x96xf32>
    tpu.vector_store %arg7[%c0_6, %c0_7], %7 {strides = array<i32>} : memref<16x96xf32, #tpu.memory_space<vmem>>, vector<16x96xf32>,
    %c0_i32_8 = arith.constant 0 : i32
    %9 = arith.cmpi eq, %arg2, %c0_i32_8 : i32
    %10 = arith.extui %9 : i1 to i32
    %c0_i32_9 = arith.constant 0 : i32
    %11 = arith.cmpi ne, %10, %c0_i32_9 : i32
    scf.if %11 {
      %c0_10 = arith.constant 0 : index
      %c0_11 = arith.constant 0 : index
      %12 = vector.load %arg7[%c0_10, %c0_11] : memref<16x96xf32, #tpu.memory_space<vmem>>, vector<16x96xf32>
      %c0_12 = arith.constant 0 : index
      %c0_13 = arith.constant 0 : index
      %13 = vector.load %arg5[%c0_12, %c0_13] : memref<1x96xf32, #tpu.memory_space<vmem>>, vector<1x96xf32>
      %14 = vector.broadcast %13 : vector<1x96xf32> to vector<16x96xf32>
      %15 = arith.addf %12, %14 : vector<16x96xf32>
      %c0_14 = arith.constant 0 : index
      %c0_15 = arith.constant 0 : index
      %16 = vector.load %arg6[%c0_14, %c0_15] : memref<16x96xf32, #tpu.memory_space<vmem>>, vector<16x96xf32>
      tpu.vector_store %arg6[%c0_14, %c0_15], %15 {strides = array<i32>} : memref<16x96xf32, #tpu.memory_space<vmem>>, vector<16x96xf32>,
    } else {
    }
    return
  }
  func.func @transform_0(%arg0: i32, %arg1: i32, %arg2: i32) -> (i32, i32) {
    %c0_i32 = arith.constant 0 : i32
    return %arg0, %arg2 : i32, i32
  }
  func.func @transform_1(%arg0: i32, %arg1: i32, %arg2: i32) -> (i32, i32) {
    %c0_i32 = arith.constant 0 : i32
    return %arg2, %arg1 : i32, i32
  }
  func.func @transform_2(%arg0: i32, %arg1: i32, %arg2: i32) -> (i32, i32) {
    %c0_i32 = arith.constant 0 : i32
    %c0_i32_0 = arith.constant 0 : i32
    return %c0_i32, %arg1 : i32, i32
  }
  func.func @transform_3(%arg0: i32, %arg1: i32, %arg2: i32) -> (i32, i32) {
    %c0_i32 = arith.constant 0 : i32
    return %arg0, %arg1 : i32, i32
  }
}

</mosaic_0001>

<bundles_post_ra>
// kernel: tpu_custom_call.1
= control target key start
LH: loop header
LB: loop body
LE: loop exit
PB: predicated region body
PF: predicated region fallthrough
CT: control target
= control target key end

     0   :  { %8 = vsyncpa [#allocation4], 0  ;;  %s274_s0 = inlined_call_operand.hbm [shape: f32[16,32], index: 0, kind: input, shape index: {}]   ;;  %s275_s1 = inlined_call_operand.hbm [shape: f32[32,96], index: 1, kind: input, shape index: {}]   ;;  %s276_s2 = inlined_call_operand.vmem [shape: f32[1,96], index: 2, kind: input, shape index: {}]   ;;  %s277_s3 = inlined_call_operand.hbm [shape: f32[16,96], index: 3, kind: output, shape index: {}]  }
   0x1   :  { %9 = vsyncpa [#allocation7], 0 }
   0x2   :  { %10 = vsyncpa [#allocation5], 0  ;;  %s15_s14 = sshll.u32 %s274_s0, 4  ;;  %s221_s15 = smov [#allocation3]   ;;  %s16_s14 = int_to_ptr.hbm [resolvable:$true] %s15_s14 }
   0x3   :  { %s17_s16 = sshll.u32 %s221_s15, 4  ;;  %s28_s19 = sshll.u32 %s275_s1, 4  ;;  %s18_s16 = int_to_ptr.vmem [resolvable:$true] %s17_s16  ;;  %s29_s19 = int_to_ptr.hbm [resolvable:$true] %s28_s19 }
   0x4   :  { %s222_s20 = smov 128   ;;  %s223_s21 = smov 8  }
   0x5   :  { %23 = dma.hbm_to_vmem [thread:$0]  %s16_s14, 256, %s18_s16, [#allocation4], %s222_s20, %s222_s20, %s223_s21  }
   0x6   :  { %s224_s22 = smov [#allocation6]  }
   0x7   :  { %s30_s23 = sshll.u32 %s224_s22, 4  ;;  %s31_s23 = int_to_ptr.vmem [resolvable:$true] %s30_s23 }
   0x8   :  { %36 = dma.hbm_to_vmem [thread:$0]  %s29_s19, 512, %s31_s23, [#allocation7], %s222_s20, %s222_s20, %s223_s21  }
   0x9   :  { %215 = dma.done.wait [#allocation4], 256  }
   0xa   :  { %216 = vsyncadd [#allocation4], 4294967040 }
   0xb   :  { %217 = dma.done.wait [#allocation7], 512  }
   0xc   :  { %218 = vsyncadd [#allocation7], 4294966784  ;;  %vm51_vm0 = vcmask 785408   ;;  %v225_v0 = vmov 0.0   ;;  %v61_v1 = vld [vmem:[#allocation6 + $0x18] sm:$0xff]  ;;  %v60_v2 = vld [vmem:[#allocation6 + $0x10] sm:$0xff] }
   0xd   :  { %52 = vst.msk [vmem:[#allocation2] sm:$0xff] %vm51_vm0, %v225_v0  ;;  %81 = vmatpush.msra.mxu0 %v61_v1  ;;  %132 = vmatpush.msra.mxu1 %v61_v1  ;;  %v59_v3 = vld [vmem:[#allocation6 + $0x8] sm:$0xff]  ;;  %v58_v4 = vld [vmem:[#allocation6] sm:$0xff]  ;;  %v56_v5 = vld [vmem:[#allocation3] sm:$0xff]  ;;  %vm62_vm1 = vcmask 261120   ;;  %s226_s24 = smov [#allocation8]  }
   0xe   :  { %53 = vst.msk [vmem:[#allocation2 + $0x8] sm:$0xff] %vm51_vm0, %v225_v0  ;;  %v57_v6 = vld [vmem:[#allocation3 + $0x8] sm:$0xff]  ;;  %v142_v13 = vld [vmem:[%s276_s2] ss:$0 sm:$0xff]  ;;  %s114_s25 = sshll.u32 %s226_s24, 4  ;;  %s116_s28 = sshll.u32 %s277_s3, 4  ;;  %s115_s25 = int_to_ptr.vmem [resolvable:$true] %s114_s25  ;;  %s117_s28 = int_to_ptr.hbm [resolvable:$true] %s116_s28 }
   0xf   :  { %82 = vmatpush.msra.mxu0 %v60_v2  ;;  %133 = vmatpush.msra.mxu1 %v60_v2 }
  0x11   :  { %83 = vmatpush.msra.mxu0 %v59_v3  ;;  %134 = vmatpush.msra.mxu1 %v59_v3 }
  0x13   :  { %84 = vmatpush.msra.mxu0 %v58_v4  ;;  %135 = vmatpush.msra.mxu1 %v58_v4 }
  0x14   :  { %130 = vmatmul.msk.f32.vlgmr.msra.gmra.mxu0 %vm62_vm1, %v56_v5  ;;  %131 = vmatmul.msk.f32.vlgmr.msra.gmra.mxu1 %vm62_vm1, %v57_v6  ;;  %v54_v7 = vld [vmem:[#allocation2] sm:$0xff] }
  0x15   :  { %v55_v8 = vld [vmem:[#allocation2 + $0x8] sm:$0xff] }
  0x91   :  { %v86_v9 = vpop.f32.mrf.mxu0  ;;  %v89_v10 = vpop.f32.mrf.mxu1 }
  0x92   :  { %v92_v11 = vadd.f32 %v86_v9, %v54_v7  ;;  %v93_v12 = vadd.f32 %v89_v10, %v55_v8 }
  0x94   :  { %95 = vst.msk [vmem:[#allocation2] sm:$0xff] %vm51_vm0, %v92_v11 }
  0x95   :  { %96 = vst.msk [vmem:[#allocation2 + $0x8] sm:$0xff] %vm51_vm0, %v93_v12 }
  0x9b   :  { %v100_v14 = vld [vmem:[#allocation2] sm:$0xff] }
  0x9c   :  { %v101_v15 = vld [vmem:[#allocation2 + $0x8] sm:$0xff]  ;;  %v106_v16 = vadd.f32 %v142_v13, %v100_v14 }
  0x9d   :  { %v107_v17 = vadd.f32 %v142_v13, %v101_v15 }
  0x9e   :  { %108 = vst.msk [vmem:[#allocation8] sm:$0xff] %vm51_vm0, %v106_v16 }
  0x9f   :  { %109 = vst.msk [vmem:[#allocation8 + $0x8] sm:$0xff] %vm51_vm0, %v107_v17 }
  0xa0   :  { %122 = dma.vmem_to_hbm [thread:$0]  %s115_s25, 256, %s117_s28, [#allocation5], %s222_s20, %s222_s20, %s223_s21  }
  0xa1   :  { %219 = dma.done.wait [#allocation5], 256  }
  0xa2   :  { %220 = vsyncadd [#allocation5], 4294967040 }
  0xa3   :  { %127 = vsyncpa [#allocation4], 1 }
  0xa4   :  { %128 = vsyncpa [#allocation7], 1 }
  0xa5   :  { %129 = vsyncpa [#allocation5], 1 }

</bundles_post_ra>
